<compile_context>
chip_gen: v7x
topology: tpu7x:2x2x1
jax: 0.10.0
libtpu: 0.0.40
codegen_flags: <defaults>
</compile_context>

<pallas_src>
import jax
import jax.numpy as jnp
from jax.experimental import pallas as pl
from jax.experimental.pallas import tpu as pltpu


def _round_up(n, m):
    return ((n + m - 1) // m) * m


def _make_kernel(*, identity, return_scores, has_pad_cols, mxu_dtype):
    def kernel(*refs):
        if identity:
            x_ref, y_ref, aux_ref = refs[:3]
            out_refs = refs[3:]
            w_ref = b_ref = yproj_ref = None
        else:
            x_ref, y_ref, aux_ref, w_ref, b_ref = refs[:5]
            out_refs = refs[5:-1]
            yproj_ref = refs[-1]
        if return_scores:
            scores_ref, alpha_ref = out_refs
        else:
            (alpha_ref,) = out_refs

        aux = aux_ref[0]                 # (3, L2p) f32
        m = aux[0:1, :]                  # mask: 0 on padded / masked columns
        w2 = aux[1:2, :]                 # mask + 1e-13 * [col < L2]

        x = x_ref[0].astype(mxu_dtype)                       # (tL1, Hp)
        if identity:
            x_proj = x
            y_proj = y_ref[0].astype(mxu_dtype)               # (L2p, Hp)
        else:
            w = w_ref[...]                                    # (Hp, Hp) bf16
            bias = b_ref[...]                                 # (1, Hp)  f32

            # y projection once per batch (L1 axis iterates sequentially).
            @pl.when(pl.program_id(1) == 0)
            def _():
                yp = jnp.dot(y_ref[0].astype(mxu_dtype), w,
                             preferred_element_type=jnp.float32) + bias
                yproj_ref[...] = jnp.maximum(yp, 0.0).astype(mxu_dtype)

            x_proj = jnp.maximum(
                jnp.dot(x, w, preferred_element_type=jnp.float32) + bias,
                0.0).astype(mxu_dtype)
            y_proj = yproj_ref[...]

        # scores = x_proj @ y_proj^T, transpose-free (contract dim 1 of both).
        scores = jax.lax.dot_general(
            x_proj, y_proj, (((1,), (1,)), ((), ())),
            preferred_element_type=jnp.float32)               # (tL1, L2p)
        if return_scores:
            scores_ref[0] = scores.astype(scores_ref.dtype)

        # AllenNLP masked softmax, folded normalization, single cross-lane sum:
        #   alpha = e*m / (sum(e*m) + 1e-13 * sum_{valid}(e)) = e*m / sum(e*w2)
        masked = scores * m
        if has_pad_cols:
            masked = masked + aux[2:3, :]                     # -1e30 on pad cols
        mx = jnp.max(masked, axis=-1, keepdims=True)
        # TODO(synk): bf16 exp would shave the EUP epilogue on v6e/v7x; kept f32
        # for v5e portability and tighter alpha accuracy.
        e = jnp.exp(masked - mx)
        denom = jnp.sum(e * w2, axis=-1, keepdims=True)
        alpha_ref[0] = ((e * m) * pl.reciprocal(denom, approx=True)
                        ).astype(alpha_ref.dtype)

    return kernel


def seq_attn_mat(x, y, y_mask, w=None, b=None, *, identity=False,
                 block_l1=None, return_scores=True,
                 out_dtype=jnp.float32, mxu_dtype=jnp.bfloat16):
    """x: (B,L1,H), y: (B,L2,H), y_mask: (B,L2).

    Returns (scores, alpha) of shape (B, L1, L2); only alpha if return_scores=False.
    """
    if not identity:
        assert w is not None and b is not None
    B, L1, H = x.shape
    _, L2, _ = y.shape
    f32 = jnp.float32

    Hp = _round_up(H, 128)                 # lane-dense contraction dim
    L2p = _round_up(L2, 128)               # lane-dense score / output dim
    has_pad_cols = L2p != L2

    # ---- generation-aware VMEM budget and L1 tile size ----------------------
    vmem_cap = 64 * 1024 * 1024            # conservative default (v7x)
    try:
        vmem_cap = int(pltpu.get_tpu_info().vmem_capacity_bytes)
    except Exception:
        pass
    budget = vmem_cap // 2
    if block_l1 is None:
        block_l1 = 512 if vmem_cap >= 96 * 1024 * 1024 else 256

    x_bytes = 2 if Hp != H else jnp.dtype(x.dtype).itemsize
    y_bytes = 2 if (Hp != H or has_pad_cols) else jnp.dtype(y.dtype).itemsize
    out_bytes = jnp.dtype(out_dtype).itemsize
    n_out = 2 if return_scores else 1

    def footprint(t):
        fp = 2 * t * Hp * x_bytes                    # x tile (double-buffered)
        fp += 2 * L2p * Hp * y_bytes                 # y block (resident per batch)
        fp += 2 * 3 * L2p * 4                        # aux (mask pack)
        fp += n_out * 2 * t * L2p * out_bytes        # outputs (double-buffered)
        fp += 4 * t * L2p * 4                        # f32 softmax temporaries
        if not identity:
            fp += Hp * Hp * 2 + 2 * Hp * 4           # W (single buffer, bf16) + bias
            fp += L2p * Hp * 2                       # y_proj scratch (bf16)
            fp += L2p * Hp * 4                       # f32 pre-relu y projection temp
        return fp

    tL1 = max(8, min(_round_up(block_l1, 8), _round_up(L1, 8)))
    while tL1 > 8 and footprint(tL1) > budget:
        tL1 = max(8, (tL1 // 2) // 8 * 8)
    L1p = _round_up(L1, tL1)

    vmem_limit = min(int(0.7 * vmem_cap),
                     max(footprint(tL1) + (8 << 20), 32 << 20))

    # ---- pad / cast inputs only when shapes require it ----------------------
    x_in = x
    if Hp != H or L1p != L1:
        x_in = jnp.zeros((B, L1p, Hp), mxu_dtype).at[:, :L1, :H].set(
            x.astype(mxu_dtype))
    y_in = y
    if Hp != H or L2p != L2:
        y_in = jnp.zeros((B, L2p, Hp), mxu_dtype).at[:, :L2, :H].set(
            y.astype(mxu_dtype))

    # aux rows: [mask, mask + 1e-13*valid, pad_bias]
    valid = (jnp.arange(L2p) < L2).astype(f32)                       # (L2p,)
    m_pad = jnp.zeros((B, L2p), f32).at[:, :L2].set(y_mask.astype(f32))
    w2 = m_pad + 1e-13 * valid[None, :]
    nb = jnp.broadcast_to((valid - 1.0) * 1e30, (B, L2p))            # 0 / -1e30
    aux = jnp.stack([m_pad, w2, nb], axis=1)                         # (B, 3, L2p)

    args = [x_in, y_in, aux]
    in_specs = [
        pl.BlockSpec((1, tL1, Hp), lambda bb, ii: (bb, ii, 0)),   # x: streams over L1
        pl.BlockSpec((1, L2p, Hp), lambda bb, ii: (bb, 0, 0)),    # y: resident per batch
        pl.BlockSpec((1, 3, L2p), lambda bb, ii: (bb, 0, 0)),     # mask pack
    ]
    scratch_shapes = []
    if not identity:
        w_in = jnp.zeros((Hp, Hp), mxu_dtype).at[:H, :H].set(w.astype(mxu_dtype))
        b_in = jnp.zeros((1, Hp), f32).at[0, :H].set(jnp.asarray(b, f32).reshape(-1))
        args += [w_in, b_in]
        # W / b have a constant block index over the whole grid -> single buffer.
        in_specs += [
            pl.BlockSpec((Hp, Hp), lambda bb, ii: (0, 0),
                         pipeline_mode=pl.Buffered(1)),
            pl.BlockSpec((1, Hp), lambda bb, ii: (0, 0),
                         pipeline_mode=pl.Buffered(1)),
        ]
        scratch_shapes = [pltpu.VMEM((L2p, Hp), mxu_dtype)]          # y_proj

    out_spec = pl.BlockSpec((1, tL1, L2p), lambda bb, ii: (bb, ii, 0))
    out_shapes, out_specs = [], []
    if return_scores:
        out_shapes.append(jax.ShapeDtypeStruct((B, L1p, L2p), out_dtype))
        out_specs.append(out_spec)
    out_shapes.append(jax.ShapeDtypeStruct((B, L1p, L2p), out_dtype))
    out_specs.append(out_spec)

    kernel = _make_kernel(identity=identity, return_scores=return_scores,
                          has_pad_cols=has_pad_cols, mxu_dtype=mxu_dtype)

    # Per-batch y_proj init needs the L1 axis to iterate sequentially.
    l1_sem = "parallel" if identity else "arbitrary"

    outs = pl.pallas_call(
        kernel,
        out_shape=tuple(out_shapes),
        grid_spec=pltpu.PrefetchScalarGridSpec(
            num_scalar_prefetch=0,
            grid=(B, L1p // tL1),
            in_specs=in_specs,
            out_specs=out_specs,
            scratch_shapes=scratch_shapes,
        ),
        compiler_params=pltpu.CompilerParams(
            dimension_semantics=("parallel", l1_sem),
            vmem_limit_bytes=vmem_limit,
        ),
    )(*args)

    # TODO(synk): extremely long L2 (y block + one score row exceeding VMEM)
    # would additionally need an L2 grid axis with a two-pass/online softmax.

    def _trim(a):
        return a if (L1p == L1 and L2p == L2) else a[:, :L1, :L2]

    if return_scores:
        scores, alpha = outs
        return _trim(scores), _trim(alpha)
    (alpha,) = outs
    return _trim(alpha)


def _reference(x, y, y_mask, w, b, *, identity=False):
    """Pure-JAX f32 reference mirroring the PyTorch module (eval mode)."""
    if identity:
        x_proj, y_proj = x, y
    else:
        x_proj = jax.nn.relu(x @ w + b)
        y_proj = jax.nn.relu(y @ w + b)
    scores = jnp.einsum("bld,bkd->blk", x_proj, y_proj)
    m = y_mask.astype(jnp.float32)[:, None, :]
    p = jax.nn.softmax(scores * m, axis=-1) * m
    alpha = p / (p.sum(-1, keepdims=True) + 1e-13)
    return scores, alpha


if __name__ == "__main__":
    B, L1, L2, H = 2, 8, 8, 32
    key = jax.random.PRNGKey(0)
    kx, ky, kw, kb = jax.random.split(key, 4)

    x = jax.random.normal(kx, (B, L1, H), dtype=jnp.float32)
    y = jax.random.normal(ky, (B, L2, H), dtype=jnp.float32)
    # Deterministic projector parameters (nn.Linear(H, H)): W: (H, H), b: (H,)
    bound = 1.0 / (H ** 0.5)
    w = jax.random.uniform(kw, (H, H), minval=-bound, maxval=bound, dtype=jnp.float32)
    bias = jax.random.uniform(kb, (H,), minval=-bound, maxval=bound, dtype=jnp.float32)
    # y_mask: 1 = valid, 0 = padded (last two positions of each row padded)
    y_mask = jnp.concatenate(
        [jnp.ones((B, L2 - 2), jnp.float32), jnp.zeros((B, 2), jnp.float32)], axis=1)

    # TODO(synk): dropout in training mode is not modeled (eval semantics only).

    # Projector path (identity=False). bf16 MXU operands -> loosened tolerances.
    scores, alpha = seq_attn_mat(x, y, y_mask, w, bias, identity=False)
    jax.block_until_ready((scores, alpha))
    ref_scores, ref_alpha = _reference(x, y, y_mask, w, bias, identity=False)
    assert scores.shape == (B, L1, L2) and alpha.shape == (B, L1, L2)
    assert jnp.allclose(scores, ref_scores, atol=2e-1, rtol=5e-2)
    assert jnp.allclose(alpha, ref_alpha, atol=4e-2, rtol=1.5e-1)
    assert jnp.allclose(alpha.sum(-1), 1.0, atol=2e-2)

    # Identity path (module default identity=True).
    s_id, a_id = seq_attn_mat(x, y, y_mask, identity=True)
    jax.block_until_ready((s_id, a_id))
    r_s, r_a = _reference(x, y, y_mask, None, None, identity=True)
    assert jnp.allclose(s_id, r_s, atol=2e-1, rtol=5e-2)
    assert jnp.allclose(a_id, r_a, atol=4e-2, rtol=1.5e-1)

    # alpha-only path (skips the scores writeback entirely).
    a_only = seq_attn_mat(x, y, y_mask, identity=True, return_scores=False)
    jax.block_until_ready(a_only)
    assert jnp.allclose(a_only, r_a, atol=4e-2, rtol=1.5e-1)

    print("KERNEL_OK")
</pallas_src>

<mosaic_0001>
module attributes {stable_mosaic.version = 11 : i64} {
  func.func @kernel(%arg0: i32, %arg1: i32, %arg2: memref<1x8x128xbf16, #tpu.memory_space<vmem>>, %arg3: memref<1x128x128xbf16, #tpu.memory_space<vmem>>, %arg4: memref<1x3x128xf32, #tpu.memory_space<vmem>>, %arg5: memref<128x128xbf16, #tpu.memory_space<vmem>>, %arg6: memref<1x128xf32, #tpu.memory_space<vmem>>, %arg7: memref<1x8x128xf32, #tpu.memory_space<vmem>>, %arg8: memref<1x8x128xf32, #tpu.memory_space<vmem>>, %arg9: memref<128x128xbf16, #tpu.memory_space<vmem>>) attributes {dimension_semantics = [#tpu.dimension_semantics<parallel>, #tpu.dimension_semantics<arbitrary>], iteration_bounds = array<i64: 2, 1>, scalar_prefetch = 0 : i64, scratch_operands = 1 : i64, tpu.core_type = #tpu.core_type<tc>, window_params = [{transform_indices = @transform_0, window_bounds = array<i64: 1, 8, 128>}, {transform_indices = @transform_1, window_bounds = array<i64: 1, 128, 128>}, {transform_indices = @transform_2, window_bounds = array<i64: 1, 3, 128>}, {pipeline_mode = #tpu.pipeline_mode<synchronous>, transform_indices = @transform_3, window_bounds = array<i64: 128, 128>}, {pipeline_mode = #tpu.pipeline_mode<synchronous>, transform_indices = @transform_4, window_bounds = array<i64: 1, 128>}, {transform_indices = @transform_5, window_bounds = array<i64: 1, 8, 128>}, {transform_indices = @transform_6, window_bounds = array<i64: 1, 8, 128>}]} {
    %c0 = arith.constant 0 : index
    %c0_0 = arith.constant 0 : index
    %c0_1 = arith.constant 0 : index
    %0 = vector.load %arg4[%c0, %c0_0, %c0_1] : memref<1x3x128xf32, #tpu.memory_space<vmem>>, vector<1x3x128xf32>
    %1 = vector.shape_cast %0 : vector<1x3x128xf32> to vector<3x128xf32>
    %2 = vector.extract_strided_slice %1 {offsets = [0, 0], sizes = [1, 128], strides = [1, 1]} : vector<3x128xf32> to vector<1x128xf32>
    %3 = vector.extract_strided_slice %1 {offsets = [1, 0], sizes = [1, 128], strides = [1, 1]} : vector<3x128xf32> to vector<1x128xf32>
    %c0_2 = arith.constant 0 : index
    %c0_3 = arith.constant 0 : index
    %c0_4 = arith.constant 0 : index
    %4 = vector.load %arg2[%c0_2, %c0_3, %c0_4] : memref<1x8x128xbf16, #tpu.memory_space<vmem>>, vector<1x8x128xbf16>
    %5 = vector.shape_cast %4 : vector<1x8x128xbf16> to vector<8x128xbf16>
    %c0_5 = arith.constant 0 : index
    %c0_6 = arith.constant 0 : index
    %6 = vector.load %arg5[%c0_5, %c0_6] : memref<128x128xbf16, #tpu.memory_space<vmem>>, vector<128x128xbf16>
    %c0_7 = arith.constant 0 : index
    %c0_8 = arith.constant 0 : index
    %7 = vector.load %arg6[%c0_7, %c0_8] : memref<1x128xf32, #tpu.memory_space<vmem>>, vector<1x128xf32>
    %c0_i32 = arith.constant 0 : i32
    %8 = arith.cmpi eq, %arg1, %c0_i32 : i32
    %9 = arith.extui %8 : i1 to i32
    %c0_i32_9 = arith.constant 0 : i32
    %10 = arith.cmpi ne, %9, %c0_i32_9 : i32
    scf.if %10 {
      %c0_22 = arith.constant 0 : index
      %c0_23 = arith.constant 0 : index
      %c0_24 = arith.constant 0 : index
      %44 = vector.load %arg3[%c0_22, %c0_23, %c0_24] : memref<1x128x128xbf16, #tpu.memory_space<vmem>>, vector<1x128x128xbf16>
      %45 = vector.shape_cast %44 : vector<1x128x128xbf16> to vector<128x128xbf16>
      %cst_25 = arith.constant dense<0.000000e+00> : vector<128x128xf32>
      %46 = tpu.matmul %45, %6, %cst_25 {dimension_numbers = #tpu.dot_dimension_numbers<[1], [0], [0], [1], [0, 0, 1, 1], [], []>} : vector<128x128xbf16>, vector<128x128xbf16>, vector<128x128xf32> -> vector<128x128xf32>
      %47 = vector.broadcast %7 : vector<1x128xf32> to vector<128x128xf32>
      %48 = arith.addf %46, %47 : vector<128x128xf32>
      %cst_26 = arith.constant 0.000000e+00 : f32
      %49 = vector.broadcast %cst_26 : f32 to vector<128x128xf32>
      %50 = arith.maximumf %48, %49 : vector<128x128xf32>
      %51 = arith.truncf %50 : vector<128x128xf32> to vector<128x128xbf16>
      %c0_27 = arith.constant 0 : index
      %c0_28 = arith.constant 0 : index
      %52 = vector.load %arg9[%c0_27, %c0_28] : memref<128x128xbf16, #tpu.memory_space<vmem>>, vector<128x128xbf16>
      tpu.vector_store %arg9[%c0_27, %c0_28], %51 {strides = array<i32>} : memref<128x128xbf16, #tpu.memory_space<vmem>>, vector<128x128xbf16>,
    } else {
    }
    %cst = arith.constant dense<0.000000e+00> : vector<8x128xf32>
    %11 = tpu.matmul %5, %6, %cst {dimension_numbers = #tpu.dot_dimension_numbers<[1], [0], [0], [1], [0, 0, 1, 1], [], []>} : vector<8x128xbf16>, vector<128x128xbf16>, vector<8x128xf32> -> vector<8x128xf32>
    %12 = vector.broadcast %7 : vector<1x128xf32> to vector<8x128xf32>
    %13 = arith.addf %11, %12 : vector<8x128xf32>
    %cst_10 = arith.constant 0.000000e+00 : f32
    %14 = vector.broadcast %cst_10 : f32 to vector<8x128xf32>
    %15 = arith.maximumf %13, %14 : vector<8x128xf32>
    %16 = arith.truncf %15 : vector<8x128xf32> to vector<8x128xbf16>
    %c0_11 = arith.constant 0 : index
    %c0_12 = arith.constant 0 : index
    %17 = vector.load %arg9[%c0_11, %c0_12] : memref<128x128xbf16, #tpu.memory_space<vmem>>, vector<128x128xbf16>
    %cst_13 = arith.constant dense<0.000000e+00> : vector<8x128xf32>
    %18 = tpu.matmul %16, %17, %cst_13 {dimension_numbers = #tpu.dot_dimension_numbers<[1], [1], [0], [0], [0, 0, 1, 0], [], []>} : vector<8x128xbf16>, vector<128x128xbf16>, vector<8x128xf32> -> vector<8x128xf32>
    %c0_14 = arith.constant 0 : index
    %c0_15 = arith.constant 0 : index
    %c0_16 = arith.constant 0 : index
    %19 = vector.load %arg7[%c0_14, %c0_15, %c0_16] : memref<1x8x128xf32, #tpu.memory_space<vmem>>, vector<1x8x128xf32>
    %20 = vector.shape_cast %19 : vector<1x8x128xf32> to vector<8x128xf32>
    %21 = vector.shape_cast %18 : vector<8x128xf32> to vector<1x8x128xf32>
    tpu.vector_store %arg7[%c0_14, %c0_15, %c0_16], %21 {strides = array<i32>} : memref<1x8x128xf32, #tpu.memory_space<vmem>>, vector<1x8x128xf32>,
    %22 = vector.broadcast %2 : vector<1x128xf32> to vector<8x128xf32>
    %23 = arith.mulf %18, %22 : vector<8x128xf32>
    %24 = vector.extract_strided_slice %1 {offsets = [2, 0], sizes = [1, 128], strides = [1, 1]} : vector<3x128xf32> to vector<1x128xf32>
    %25 = vector.broadcast %24 : vector<1x128xf32> to vector<8x128xf32>
    %26 = arith.addf %23, %25 : vector<8x128xf32>
    %cst_17 = arith.constant dense<0xFF800000> : vector<8xf32>
    %27 = vector.multi_reduction <maximumf>, %26, %cst_17 [1] : vector<8x128xf32> to vector<8xf32>
    %28 = vector.shape_cast %27 : vector<8xf32> to vector<8x1xf32>
    %29 = vector.broadcast %28 : vector<8x1xf32> to vector<8x128xf32>
    %30 = arith.subf %26, %29 : vector<8x128xf32>
    %31 = math.exp %30 : vector<8x128xf32>
    %32 = vector.broadcast %3 : vector<1x128xf32> to vector<8x128xf32>
    %33 = arith.mulf %31, %32 : vector<8x128xf32>
    %cst_18 = arith.constant dense<0.000000e+00> : vector<8xf32>
    %34 = vector.multi_reduction <add>, %33, %cst_18 [1] : vector<8x128xf32> to vector<8xf32>
    %35 = vector.shape_cast %34 : vector<8xf32> to vector<8x1xf32>
    %36 = vector.broadcast %2 : vector<1x128xf32> to vector<8x128xf32>
    %37 = arith.mulf %31, %36 : vector<8x128xf32>
    %38 = tpu.reciprocal %35 {approx = true} : vector<8x1xf32> -> vector<8x1xf32>
    %39 = vector.broadcast %38 : vector<8x1xf32> to vector<8x128xf32>
    %40 = arith.mulf %37, %39 : vector<8x128xf32>
    %c0_19 = arith.constant 0 : index
    %c0_20 = arith.constant 0 : index
    %c0_21 = arith.constant 0 : index
    %41 = vector.load %arg8[%c0_19, %c0_20, %c0_21] : memref<1x8x128xf32, #tpu.memory_space<vmem>>, vector<1x8x128xf32>
    %42 = vector.shape_cast %41 : vector<1x8x128xf32> to vector<8x128xf32>
    %43 = vector.shape_cast %40 : vector<8x128xf32> to vector<1x8x128xf32>
    tpu.vector_store %arg8[%c0_19, %c0_20, %c0_21], %43 {strides = array<i32>} : memref<1x8x128xf32, #tpu.memory_space<vmem>>, vector<1x8x128xf32>,
    return
  }
  func.func @transform_0(%arg0: i32, %arg1: i32) -> (i32, i32, i32) {
    %c0_i32 = arith.constant 0 : i32
    %c0_i32_0 = arith.constant 0 : i32
    return %arg0, %arg1, %c0_i32 : i32, i32, i32
  }
  func.func @transform_1(%arg0: i32, %arg1: i32) -> (i32, i32, i32) {
    %c0_i32 = arith.constant 0 : i32
    %c0_i32_0 = arith.constant 0 : i32
    %c0_i32_1 = arith.constant 0 : i32
    return %arg0, %c0_i32, %c0_i32_0 : i32, i32, i32
  }
  func.func @transform_2(%arg0: i32, %arg1: i32) -> (i32, i32, i32) {
    %c0_i32 = arith.constant 0 : i32
    %c0_i32_0 = arith.constant 0 : i32
    %c0_i32_1 = arith.constant 0 : i32
    return %arg0, %c0_i32, %c0_i32_0 : i32, i32, i32
  }
  func.func @transform_3(%arg0: i32, %arg1: i32) -> (i32, i32) {
    %c0_i32 = arith.constant 0 : i32
    %c0_i32_0 = arith.constant 0 : i32
    %c0_i32_1 = arith.constant 0 : i32
    return %c0_i32, %c0_i32_0 : i32, i32
  }
  func.func @transform_4(%arg0: i32, %arg1: i32) -> (i32, i32) {
    %c0_i32 = arith.constant 0 : i32
    %c0_i32_0 = arith.constant 0 : i32
    %c0_i32_1 = arith.constant 0 : i32
    return %c0_i32, %c0_i32_0 : i32, i32
  }
  func.func @transform_5(%arg0: i32, %arg1: i32) -> (i32, i32, i32) {
    %c0_i32 = arith.constant 0 : i32
    %c0_i32_0 = arith.constant 0 : i32
    return %arg0, %arg1, %c0_i32 : i32, i32, i32
  }
  func.func @transform_6(%arg0: i32, %arg1: i32) -> (i32, i32, i32) {
    %c0_i32 = arith.constant 0 : i32
    %c0_i32_0 = arith.constant 0 : i32
    return %arg0, %arg1, %c0_i32 : i32, i32, i32
  }
}

</mosaic_0001>

<bundles_post_ra>
// kernel: tpu_custom_call.1
= control target key start
LH: loop header
LB: loop body
LE: loop exit
PB: predicated region body
PF: predicated region fallthrough
CT: control target
= control target key end

     0   :  { %12 = vsyncpa [#allocation4], 0  ;;  %s1779_s0 = inlined_call_operand.vmem [shape: bf16[2,8,128], index: 0, kind: input, shape index: {}]   ;;  %s1780_s1 = inlined_call_operand.hbm [shape: bf16[2,128,128], index: 1, kind: input, shape index: {}]   ;;  %s1781_s2 = inlined_call_operand.vmem [shape: f32[2,3,128], index: 2, kind: input, shape index: {}]   ;;  %s1782_s3 = inlined_call_operand.hbm [shape: bf16[128,128], index: 3, kind: input, shape index: {}]   ;;  %s1783_s4 = inlined_call_operand.vmem [shape: f32[1,128], index: 4, kind: input, shape index: {}]   ;;  %s1784_s5 = inlined_call_operand.hbm [shape: f32[2,8,128], index: 5, kind: output, shape index: {0}]   ;;  %s1785_s6 = inlined_call_operand.hbm [shape: f32[2,8,128], index: 6, kind: output, shape index: {1}]  }
   0x1   :  { %14 = vsyncpa [#allocation4 + $0x1], 0 }
   0x2   :  { %15 = vsyncpa [#allocation7], 0 }
   0x3   :  { %16 = vsyncpa [#allocation5], 0 }
   0x4   :  { %18 = vsyncpa [#allocation5 + $0x1], 0 }
   0x5   :  { %19 = vsyncpa [#allocation10], 0 }
   0x6   :  { %21 = vsyncpa [#allocation10 + $0x1], 0  ;;  %s1458_s21 = smov 0   ;;  %s1460_s22 = smov 0  }
   0x7   :  { %s1462_s23 = smov 0   ;;  %s1464_s24 = smov 0  }
   0x8   :  { %s1466_s25 = smov 0   ;;  %s1468_s26 = smov 0  }
   0x9 LB: > { %s982_s27 = sadd.s32 4294967295, %s1413_s26   ;;  %s983_s28 = sadd.s32 4294967294, %s1413_s26   ;;  %s1413_s26 = sphi %s1468_s26, %s27_s26   ;;  %s1409_s25 = sphi %s1466_s25, %s1817_s25   ;;  %s1405_s24 = sphi %s1464_s24, %s1816_s24   ;;  %s1401_s23 = sphi %s1462_s23, %s1815_s23   ;;  %s1397_s22 = sphi %s1460_s22, %s1814_s22   ;;  %s1393_s21 = sphi %s1458_s21, %s1813_s21  }
   0xa   : > { %p87_p0 = scmp.ne.s32.totalorder %s1397_s22, %s1393_s21  ;;  %p1492_p1 = scmp.eq.s32.totalorder %s982_s27, 0 }
   0xb   : > { %p1496_p2 = scmp.eq.s32.totalorder %s982_s27, 1  ;;  %p187_p3 = scmp.eq.s32.totalorder %s983_s28, 1 }
   0xc   : > { %s1794_s29 = scalar_select %p1492_p1, 1, 0 }
   0xd   : > { %s1795_s30 = scalar_select %p1496_p2, 1, 0 }
   0xe   : > { %p1502_p4 = por %p1492_p1, %p87_p0  ;;  %p984_p5 = scmp.ge.s32.totalorder %s1413_s26, 1 }
   0xf   : > { %p1507_p6 = por %p187_p3, %p87_p0  ;;  %p222_p7 = scmp.lt.s32.totalorder %s1413_s26, 3 }
  0x10   : > { %s1796_s7 = scalar_select %p1502_p4, 1, 0 }
  0x11   : > { %s1797_s8 = scalar_select %p1507_p6, 1, 0 }
  0x12   : > { %p1512_p8 = pnand %p984_p5, %p222_p7  ;;  %s1415_s10 = smov [#allocation6]  }
  0x13   : > { %s234_s11 = sshll.u32 %s1415_s10, 4  ;;  %s39_s13 = sadd.s32 1, %s1409_s25  ;;  %s235_s11 = int_to_ptr.vmem [resolvable:$true] %s234_s11 }
  0x14   : > { %s1798_s9 = scalar_select %p1512_p8, 1, 0 }
  0x15   : > { %p1145_p9 = pneg %p1512_p8  ;;  %s1237_s16 = scalar_lea.hbm %s1782_s3, 1024 }
  0x16   : > { %p1238_p12 = scmp.ne.s32.totalorder %s1782_s3, %s1237_s16  ;;  %p1244_p5 = scmp.lt.u32.totalorder %s1237_s16, %s1782_s3 }
  0x17   : > { %p1521_p11 = pnand %p1145_p9, %p1492_p1 }
  0x19   : > { %p1239_p13 = pneg %p1521_p11 }
  0x1b   : > { %p1240_p0 = pnand %p1239_p13, %p1238_p12 }
  0x1d   : > { %p1241_p3 = pneg %p1240_p0 }
  0x1f   : > { %p1246_p7 = pnand %p1244_p5, %p1241_p3 }
  0x21   : > { %1249 = shalt.err (!%p1246_p7)
}
  0x22   : > { %s1250_s27 = scalar_lea.vmem %s235_s11, 1024  ;;  %p1258_p1 = scmp.lt.s32.totalorder %s235_s11, %s235_s11 }
  0x23   : > { %p1251_p9 = scmp.ne.s32.totalorder %s235_s11, %s1250_s27  ;;  %p1259_p4 = scmp.lt.s32.totalorder %s1250_s27, %s1250_s27 }
  0x25   : > { %p1253_p10 = pnand %p1251_p9, %p1239_p13  ;;  %p1260_p8 = por %p1259_p4, %p1258_p1 }
  0x27   : > { %p1254_p6 = pneg %p1253_p10 }
  0x29   : > { %p1261_p2 = pnand %p1260_p8, %p1254_p6 }
  0x2b   : > { %1264 = shalt.err (!%p1261_p2)
}
  0x2c   : > { %s1790_s28 = smov 64   ;;  %s1791_s10 = smov 4  }
  0x2d   : > { %1148 = dma.hbm_to_vmem [thread:$0]  (!%p1521_p11), %s1782_s3, 1024, %s235_s11, [#allocation7], %s1790_s28, %s1790_s28, %s1791_s10  }
  0x2e   : > { %p41_p1 = scmp.ge.s32.totalorder %s39_s13, 2  ;;  %s74_s16 = sadd.s32 1, %s1401_s23 }
  0x2f   : > { %p81_p2 = scmp.ne.s32.totalorder %s1401_s23, %s1397_s22  ;;  %p82_p4 = scmp.eq.s32.totalorder %s1413_s26, 0 }
  0x30   : > { %s1819_s13 = smov (%p41_p1, %s39_s13), 0  ;;  %p1801_p8 = scmp.ne.s32.totalorder %s1795_s30, 0 }
  0x31   : > { %p1551_p6 = por %p82_p4, %p81_p2  ;;  %s71_s18 = ssub.s32 %s1409_s25, %s1819_s13 }
  0x32   : > { %p1557_p10 = por %p1801_p8, %p81_p2  ;;  %p1161_p12 = scmp.lt.s32.totalorder %s1413_s26, 2 }
  0x33   : > { %p72_p11 = scmp.eq.s32.totalorder %s71_s18, 0  ;;  %s261_s11 = sand.u32 1, %s1401_s23  }
  0x34   : > { %s987_s19 = sshll.u32 %s261_s11, 6  ;;  %s1027_s27 = sshll.u32 %s1409_s25, 10 }
  0x35   : > { %s1566_s20 = scalar_select %p72_p11, %s1401_s23, %s74_s16  }
  0x36   : > { %s1572_s28 = scalar_lea.hbm %s1780_s1, %s1027_s27  ;;  %s265_s30 = scalar_lea.vmem [#allocation3], %s987_s19 }
  0x37   : > { %s272_s10 = sshll.u32 %s265_s30, 4  ;;  %p1578_p13 = pnand %p1161_p12, %p1551_p6  ;;  %s1574_s10 = int_to_ptr.vmem [resolvable:$true] %s272_s10 }
  0x38   : > { %s1582_s16 = scalar_lea.sflag [#allocation4], %s261_s11  ;;  %s1265_s14 = scalar_lea.hbm %s1572_s28, 1024 }
  0x39   : > { %p1266_p0 = scmp.ne.s32.totalorder %s1572_s28, %s1265_s14  ;;  %p1267_p3 = pneg %p1578_p13 }
  0x3a   : > { %s1270_s17 = scalar_lea.hbm %s1780_s1, 2048  ;;  %p1271_p9 = scmp.lt.u32.totalorder %s1572_s28, %s1780_s1 }
  0x3b   : > { %p1268_p5 = pnand %p1267_p3, %p1266_p0  ;;  %p1272_p1 = scmp.lt.u32.totalorder %s1270_s17, %s1265_s14 }
  0x3c   : > { %p1274_p4 = scmp.lt.u32.totalorder %s1265_s14, %s1572_s28 }
  0x3d   : > { %p1269_p7 = pneg %p1268_p5  ;;  %p1273_p2 = por %p1272_p1, %p1271_p9 }
  0x3f   : > { %p1275_p6 = por %p1274_p4, %p1273_p2 }
  0x41   : > { %p1276_p8 = pnand %p1275_p6, %p1269_p7 }
  0x43   : > { %1279 = shalt.err (!%p1276_p8)
}
  0x44   : > { %s1280_s11 = scalar_lea.vmem %s1574_s10, 1024  ;;  %s1418_s19 = smov [#allocation3]  }
  0x45   : > { %p1281_p12 = scmp.ne.s32.totalorder %s1574_s10, %s1280_s11  ;;  %s1285_s27 = sshll.u32 %s1418_s19, 4  ;;  %s1286_s27 = int_to_ptr.vmem [resolvable:$false] %s1285_s27 }
  0x46   : > { %s1287_s15 = scalar_lea.vmem %s1286_s27, 2048  ;;  %p1288_p5 = scmp.lt.s32.totalorder %s1574_s10, %s1286_s27 }
  0x47   : > { %p1283_p11 = pnand %p1281_p12, %p1267_p3  ;;  %p1289_p9 = scmp.lt.s32.totalorder %s1287_s15, %s1280_s11 }
  0x49   : > { %p1284_p0 = pneg %p1283_p11  ;;  %p1290_p1 = por %p1289_p9, %p1288_p5 }
  0x4b   : > { %p1291_p2 = pnand %p1290_p1, %p1284_p0 }
  0x4d   : > { %1294 = shalt.err (!%p1291_p2)
}
  0x4e   : > { %s1804_s14 = smov 4   ;;  %s1805_s17 = smov 64  }
  0x4f   : > { %1152 = dma.hbm_to_vmem [thread:$0]  (!%p1578_p13), %s1572_s28, 1024, %s1574_s10, %s1582_s16, %s1805_s17, %s1805_s17, %s1804_s14  }
  0x50   : > { %p1806_p3 = scmp.ne.s32.totalorder %s1798_s9, 0 }
  0x51   : > { %s1616_s30 = sand.u32 (!%p1806_p3), 1, %s1397_s22   ;;  %p1807_p7 = scmp.ne.s32.totalorder (!%p1806_p3), %s1796_s7, 0 }
  0x52   : > { %291 = sbr.rel (%p1806_p3) target bundleno = 955 (0x3bb), region = 40  ;;  %s991_s11 = sshll.u32 (!%p1806_p3), %s1616_s30, 6 }
  0x53   : > { %s294_s19 = scalar_lea.sflag (!%p1806_p3), [#allocation4], %s1616_s30  ;;  %s1620_s27 = scalar_lea.vmem (!%p1806_p3), [#allocation3], %s991_s11 }
  0x59   : > { %1376 = dma.done.wait (%p1807_p7), %s294_s19, 1024  }
  0x5a   : > { %1378 = vsyncadd (%p1807_p7), %s294_s19, 4294966272  ;;  %p1808_p13 = scmp.ne.s32.totalorder %s1794_s29, 0 }
  0x5c   : > { %1380 = dma.done.wait (%p1808_p13), [#allocation7], 1024  }
  0x5d   : > { %1382 = vsyncadd (%p1808_p13), [#allocation7], 4294966272  ;;  %v1419_v0 = vmov 0.0   ;;  %vm1420_vm0 = vmmov 0   ;;  %v1217_v1 = vld [vmem:[#allocation6] sm:$0xff]   ;;  %v1218_v2 = vld [vmem:[#allocation6 + $0x8] sm:$0xff]  }
  0x5e   : > { %1115 = vmatprep.subr.bf16.mxu0 %v1419_v0  ;;  %1131 = vmatprep.mubr.msk.bf16.mxu0 %vm1420_vm0, %v1419_v0  ;;  %v1219_v3 = vld [vmem:[#allocation6 + $0x10] sm:$0xff]   ;;  %v1220_v4 = vld [vmem:[#allocation6 + $0x18] sm:$0xff]   ;;  %v1225_v5 = vld [vmem:[%s1620_s27] sm:$0xff]   ;;  %p346_p4 = scmp.lt.s32.totalorder %s1405_s24, 1  ;;  %s1793_s11 = sshll.u32 %s1616_s30, 3 }
  0x5f   : > { %1063 = vmatprep.subr.bf16.mxu1 %v1217_v1  ;;  %1079 = vmatprep.mubr.bf16.mxu1 %v1225_v5  ;;  %v1221_v6 = vld [vmem:[#allocation6 + $0x20] sm:$0xff]   ;;  %v1222_v7 = vld [vmem:[#allocation6 + $0x28] sm:$0xff]   ;;  %v1223_v8 = vld [vmem:[#allocation6 + $0x30] sm:$0xff]   ;;  %s338_s19 = scalar_lea.vmem [#allocation8], %s1793_s11  ;;  %s1421_s16 = smov [#allocation8]  }
  0x60   : > { %1064 = vmatpush3.bf16.msra.mxu1 %v1217_v1  ;;  %v1224_v9 = vld [vmem:[#allocation6 + $0x38] sm:$0xff]   ;;  %v1226_v10 = vld [vmem:[%s1620_s27 + $0x8] sm:$0xff]   ;;  %v1227_v11 = vld [vmem:[%s1620_s27 + $0x10] sm:$0xff]   ;;  %s1648_s29 = scalar_select %p346_p4, %s1405_s24, 1 }
  0x61   : > { %1065 = vmatprep.subr.bf16.mxu1 %v1218_v2  ;;  %v1228_v12 = vld [vmem:[%s1620_s27 + $0x18] sm:$0xff]   ;;  %v1229_v13 = vld [vmem:[%s1620_s27 + $0x20] sm:$0xff]   ;;  %v1230_v14 = vld [vmem:[%s1620_s27 + $0x28] sm:$0xff]   ;;  %s1299_s15 = sshll.u32 %s1421_s16, 4  ;;  %s1300_s15 = int_to_ptr.vmem [resolvable:$false] %s1299_s15 }
  0x62   : > { %v1231_v15 = vld [vmem:[%s1620_s27 + $0x30] sm:$0xff]   ;;  %v1232_v16 = vld [vmem:[%s1620_s27 + $0x38] sm:$0xff]   ;;  %s995_s7 = sshll.u32 %s1648_s29, 2  ;;  %v1664_v18 = vld [vmem:[%s1783_s4] ss:$0 sm:$0xff]  ;;  %s819_s27 = sshll.u32 %s338_s19, 4  ;;  %s1698_s27 = int_to_ptr.vmem [resolvable:$true] %s819_s27 }
  0x63   : > { %s352_s10 = scalar_lea.vmem %s1779_s0, %s995_s7  ;;  %s356_s17 = scalar_lea.vmem %s1781_s2, %s995_s7 }
  0x64   : > { %1066 = vmatpush3.bf16.msra.mxu1 %v1218_v2  ;;  %v359_v17 = vld [vmem:[%s352_s10] sm:$0xf]  ;;  %s1792_s29 = sshll.u32 %s1405_s24, 7  ;;  %s800_s10 = scalar_lea.sflag [#allocation5], %s1616_s30 }
  0x65   : > { %1067 = vmatprep.subr.bf16.mxu1 %v1219_v3  ;;  %s817_s28 = scalar_lea.hbm %s1784_s5, %s1792_s29  ;;  %s1295_s18 = scalar_lea.vmem %s1698_s27, 128 }
  0x66   : > { %p1296_p6 = scmp.ne.s32.totalorder %s1698_s27, %s1295_s18  ;;  %s1301_s14 = scalar_lea.vmem %s1300_s15, 256 }
  0x67   : > { %p1302_p11 = scmp.lt.s32.totalorder %s1698_s27, %s1300_s15  ;;  %p1303_p0 = scmp.lt.s32.totalorder %s1301_s14, %s1295_s18 }
  0x68   : > { %1068 = vmatpush3.bf16.msra.mxu1 %v1219_v3  ;;  %p1297_p8 = pnand %p1296_p6, %p1557_p10 }
  0x69   : > { %1069 = vmatprep.subr.bf16.mxu1 %v1220_v4  ;;  %p1304_p5 = por %p1303_p0, %p1302_p11 }
  0x6a   : > { %p1298_p12 = pneg %p1297_p8 }
  0x6c   : > { %1070 = vmatpush3.bf16.msra.mxu1 %v1220_v4  ;;  %p1305_p9 = pnand %p1304_p5, %p1298_p12 }
  0x6d   : > { %1071 = vmatprep.subr.bf16.mxu1 %v1221_v6 }
  0x70   : > { %1072 = vmatpush3.bf16.msra.mxu1 %v1221_v6 }
  0x71   : > { %1073 = vmatprep.subr.bf16.mxu1 %v1222_v7 }
  0x74   : > { %1074 = vmatpush3.bf16.msra.mxu1 %v1222_v7 }
  0x75   : > { %1075 = vmatprep.subr.bf16.mxu1 %v1223_v8 }
  0x78   : > { %1076 = vmatpush3.bf16.msra.mxu1 %v1223_v8 }
  0x79   : > { %1077 = vmatprep.subr.bf16.mxu1 %v1224_v9 }
  0x7c   : > { %1078 = vmatpush3.bf16.msra.mxu1 %v1224_v9 }
  0x7d   : > { %1095 = vmatprep.subr.bf16.mxu1 %v1419_v0 }
  0x7f   : > { %1080 = vmatmul.mubr.bf16.vlgmr.msra.gmra.mrb[0].mxu1 %v1226_v10 }
  0x80   : > { %1083 = vmatprep.mubr.bf16.mxu1 %v1227_v11  ;;  %1096 = vmatpush3.bf16.msra.mxu1 %v1217_v1 }
  0x81   : > { %1097 = vmatprep.subr.bf16.mxu1 %v1419_v0 }
  0x84   : > { %1098 = vmatpush3.bf16.msra.mxu1 %v1218_v2 }
  0x85   : > { %1099 = vmatprep.subr.bf16.mxu1 %v1419_v0 }
  0x87   : > { %1084 = vmatmul.mubr.bf16.gmra.mrb[4].mxu1 %v1228_v12 }
  0x88   : > { %1087 = vmatprep.mubr.bf16.mxu1 %v1229_v13  ;;  %1100 = vmatpush3.bf16.msra.mxu1 %v1219_v3 }
  0x89   : > { %1101 = vmatprep.subr.bf16.mxu1 %v1419_v0 }
  0x8c   : > { %1102 = vmatpush3.bf16.msra.mxu1 %v1220_v4 }
  0x8d   : > { %1103 = vmatprep.subr.bf16.mxu1 %v1419_v0 }
  0x8f   : > { %1088 = vmatmul.mubr.bf16.gmra.mrb[8].mxu1 %v1230_v14 }
  0x90   : > { %1091 = vmatprep.mubr.bf16.mxu1 %v1231_v15  ;;  %1104 = vmatpush3.bf16.msra.mxu1 %v1221_v6 }
  0x91   : > { %1105 = vmatprep.subr.bf16.mxu1 %v1419_v0 }
  0x94   : > { %1106 = vmatpush3.bf16.msra.mxu1 %v1222_v7 }
  0x95   : > { %1107 = vmatprep.subr.bf16.mxu1 %v1419_v0 }
  0x97   : > { %1092 = vmatmul.mubr.bf16.gmra.mrb[12].mxu1 %v1232_v16 }
  0x98   : > { %1108 = vmatpush3.bf16.msra.mxu1 %v1223_v8  ;;  %1111 = vmatprep.mubr.msk.bf16.mxu1 %vm1420_vm0, %v1419_v0 }
  0x99   : > { %1109 = vmatprep.subr.bf16.mxu1 %v1419_v0 }
  0x9c   : > { %1110 = vmatpush3.bf16.msra.mxu1 %v1224_v9 }
  0x9f   : > { %1112 = vmatmul.mubr.bf16.vlgmr.msra.gmra.mrb[16].mxu1 %v359_v17 }
 0x152   : > { %v1081_v19 = vpop.f32.mrb[0].mxu1 }
 0x153   : > { %v542_v20 = vadd.f32 %v1081_v19, %v1664_v18  ;;  %v533_v21 = vpop.f32.mrb[1].mxu1 }
 0x154   : > { %v534_v22 = vadd.f32 %v1664_v18, %v533_v21  ;;  %v1082_v23 = vpop.f32.mrb[2].mxu1 }
 0x155   : > { %v545_v24 = vadd.f32 %v1082_v23, %v1664_v18  ;;  %v536_v25 = vpop.f32.mrb[3].mxu1  ;;  %v598_v27 = vmax.f32 %v542_v20, 0.0  ;;  %v398_v20 = vlaneseq  ;;  %v358_v23 = vld [vmem:[%s356_s17] sm:$0x7] }
 0x156   : > { %v537_v26 = vadd.f32 %v1664_v18, %v536_v25  ;;  %v596_v29 = vmax.f32 %v534_v22, 0.0 }
 0x157   : > { %v599_v28 = vmax.f32 %v545_v24, 0.0  ;;  %v399_v21 = vshrl.u32 %v398_v20, 7 }
 0x158   : > { %v597_v30 = vmax.f32 %v537_v26, 0.0 }
 0x159   : > { %v613_v31 = vpack.c.bf16 %v599_v28, %v598_v27  ;;  %v400_v22 = vsub.s32 0, %v399_v21  ;;  %v780_v24 = vsub.s32 2, %v399_v21 }
 0x15a   : > { %v612_v32 = vpack.c.bf16 %v597_v30, %v596_v29  ;;  %v1085_v33 = vpop.f32.mrb[4].mxu1 }
 0x15b   : > { %v558_v34 = vadd.f32 %v1085_v33, %v1664_v18  ;;  %v549_v35 = vpop.f32.mrb[5].mxu1  ;;  %v776_v25 = vrot.slane %v358_v23, %v400_v22 }
 0x15c   : > { %1116 = vmatpush3.bf16.xpose.msra.mxu0 %v612_v32  ;;  %v550_v36 = vadd.f32 %v1664_v18, %v549_v35  ;;  %v1086_v37 = vpop.f32.mrb[6].mxu1 }
 0x15d   : > { %v602_v38 = vmax.f32 %v558_v34, 0.0  ;;  %v561_v39 = vadd.f32 %v1086_v37, %v1664_v18  ;;  %v552_v40 = vpop.f32.mrb[7].mxu1  ;;  %1117 = vmatprep.subr.bf16.mxu0 %v1419_v0  ;;  %v790_v34 = vsub.s32 1, %v399_v21 }
 0x15e   : > { %v600_v41 = vmax.f32 %v550_v36, 0.0  ;;  %v553_v42 = vadd.f32 %v1664_v18, %v552_v40 }
 0x15f   : > { %v603_v43 = vmax.f32 %v561_v39, 0.0  ;;  %v791_v35 = vrot.slane %v358_v23, %v790_v34 }
 0x160   : > { %v601_v44 = vmax.f32 %v553_v42, 0.0 }
 0x161   : > { %v615_v45 = vpack.c.bf16 %v603_v43, %v602_v38 }
 0x162   : > { %v614_v46 = vpack.c.bf16 %v601_v44, %v600_v41  ;;  %v1089_v47 = vpop.f32.mrb[8].mxu1 }
 0x163   : > { %v574_v48 = vadd.f32 %v1089_v47, %v1664_v18  ;;  %v565_v49 = vpop.f32.mrb[9].mxu1 }
 0x164   : > { %1118 = vmatpush3.bf16.xpose.msra.mxu0 %v613_v31  ;;  %v566_v50 = vadd.f32 %v1664_v18, %v565_v49  ;;  %v1090_v51 = vpop.f32.mrb[10].mxu1 }
 0x165   : > { %1119 = vmatprep.subr.bf16.mxu0 %v1419_v0  ;;  %v606_v52 = vmax.f32 %v574_v48, 0.0  ;;  %v577_v53 = vadd.f32 %v1090_v51, %v1664_v18  ;;  %v568_v54 = vpop.f32.mrb[11].mxu1 }
 0x166   : > { %v604_v55 = vmax.f32 %v566_v50, 0.0  ;;  %v569_v56 = vadd.f32 %v1664_v18, %v568_v54 }
 0x167   : > { %v607_v57 = vmax.f32 %v577_v53, 0.0 }
 0x168   : > { %v605_v58 = vmax.f32 %v569_v56, 0.0 }
 0x169   : > { %v617_v59 = vpack.c.bf16 %v607_v57, %v606_v52 }
 0x16a   : > { %v616_v60 = vpack.c.bf16 %v605_v58, %v604_v55  ;;  %v1093_v61 = vpop.f32.mrb[12].mxu1 }
 0x16b   : > { %v590_v62 = vadd.f32 %v1093_v61, %v1664_v18  ;;  %v581_v63 = vpop.f32.mrb[13].mxu1 }
 0x16c   : > { %1120 = vmatpush3.bf16.xpose.msra.mxu0 %v614_v46  ;;  %v582_v1 = vadd.f32 %v1664_v18, %v581_v63  ;;  %v1094_v2 = vpop.f32.mrb[14].mxu1 }
 0x16d   : > { %1121 = vmatprep.subr.bf16.mxu0 %v1419_v0  ;;  %v610_v3 = vmax.f32 %v590_v62, 0.0  ;;  %v593_v4 = vadd.f32 %v1094_v2, %v1664_v18  ;;  %v584_v5 = vpop.f32.mrb[15].mxu1 }
 0x16e   : > { %v608_v6 = vmax.f32 %v582_v1, 0.0  ;;  %v585_v7 = vadd.f32 %v1664_v18, %v584_v5 }
 0x16f   : > { %v611_v8 = vmax.f32 %v593_v4, 0.0 }
 0x170   : > { %v609_v9 = vmax.f32 %v585_v7, 0.0 }
 0x171   : > { %v619_v10 = vpack.c.bf16 %v611_v8, %v610_v3 }
 0x172   : > { %v618_v11 = vpack.c.bf16 %v609_v9, %v608_v6  ;;  %v716_v12 = vpop.f32.mrb[16].mxu1 }
 0x173   : > { %v1113_v13 = vpop.f32.mrb[17].mxu1  ;;  %v717_v16 = vadd.f32 %v1664_v18, %v716_v12 }
 0x174   : > { %1122 = vmatpush3.bf16.xpose.msra.mxu0 %v615_v45  ;;  %v719_v14 = vpop.f32.mrb[18].mxu1 }
 0x175   : > { %1123 = vmatprep.subr.bf16.mxu0 %v1419_v0  ;;  %v1114_v15 = vpop.f32.mrb[19].mxu1  ;;  %v722_v17 = vmax.f32 %v717_v16, 0.0 }
 0x177   : > { %v723_v19 = vpack.c.bf16 %v722_v17, %v722_v17 }
 0x17c   : > { %1124 = vmatpush3.bf16.xpose.msra.mxu0 %v616_v60 }
 0x17d   : > { %1125 = vmatprep.subr.bf16.mxu0 %v1419_v0 }
 0x184   : > { %1126 = vmatpush3.bf16.xpose.msra.mxu0 %v617_v59 }
 0x185   : > { %1127 = vmatprep.subr.bf16.mxu0 %v1419_v0 }
 0x18c   : > { %1128 = vmatpush3.bf16.xpose.msra.mxu0 %v618_v11 }
 0x18d   : > { %1129 = vmatprep.subr.bf16.mxu0 %v1419_v0  ;;  %v781_v0 = vrot.slane %v358_v23, %v780_v24 }
 0x194   : > { %1130 = vmatpush3.bf16.xpose.msra.mxu0 %v619_v10 }
 0x19b   : > { %1132 = vmatmul.mubr.bf16.vlgmr.msra.gmra.mrb[0].mxu0 %v723_v19 }
 0x26e   : > { %v766_v26 = vpop.f32.mrb[0].mxu0 }
 0x26f   : > { %772 = vst [vmem:[%s338_s19] sm:$0xff] %v766_v26  ;;  %v777_v18 = vmul.f32 %v776_v25, %v766_v26  ;;  %v1133_v27 = vpop.f32.mrb[1].mxu0 }
 0x270   : > { %v769_v28 = vpop.f32.mrb[2].mxu0 }
 0x271   : > { %v1134_v29 = vpop.f32.mrb[3].mxu0  ;;  %v782_v30 = vadd.f32 %v781_v0, %v777_v18 }
 0x273   : > { %783 = vmax.xlane.f32.xlu0 %v782_v30 }
 0x300   : > { %v784_v31 = vpop.xlane.xlu0 %783 }
 0x301   : > { %v785_v32 = vsub.f32 %v782_v30, %v784_v31 }
 0x303   : > { %v786_v33 = vmul.f32 1.442695, %v785_v32 }
 0x305   : > { %1233 = vpow2.f32 %v786_v33 }
 0x30f   : > { %v1234_v36 = vpop.eup %1233 }
 0x310   : > { %v792_v37 = vmul.f32 %v1234_v36, %v791_v35 }
 0x312   : > { %793 = vadd.xlane.f32.xlu0 %v792_v37 }
 0x313   : > { %1308 = shalt.err (!%p1305_p9)
}
 0x314   : > { %s1309_s17 = scalar_lea.hbm %s817_s28, 128  ;;  %s1313_s9 = scalar_lea.hbm %s1784_s5, 256 }
 0x315   : > { %p1310_p1 = scmp.ne.s32.totalorder %s817_s28, %s1309_s17  ;;  %p1314_p7 = scmp.lt.u32.totalorder %s817_s28, %s1784_s5 }
 0x316   : > { %p1315_p13 = scmp.lt.u32.totalorder %s1313_s9, %s1309_s17  ;;  %p1317_p6 = scmp.lt.u32.totalorder %s1309_s17, %s817_s28 }
 0x317   : > { %p1311_p2 = pnand %p1310_p1, %p1557_p10 }
 0x318   : > { %p1316_p4 = por %p1315_p13, %p1314_p7 }
 0x319   : > { %p1312_p3 = pneg %p1311_p2 }
 0x31a   : > { %p1318_p8 = por %p1317_p6, %p1316_p4 }
 0x31c   : > { %p1319_p12 = pnand %p1318_p8, %p1312_p3 }
 0x31e   : > { %1322 = shalt.err (!%p1319_p12)
}
 0x31f   : > { %1141 = dma.vmem_to_hbm [thread:$0]  (%p1557_p10), %s1698_s27, 128, %s817_s28, %s800_s10   ;;  %v795_v39 = vmul.f32 %v1234_v36, %v776_v25 }
 0x320   : > { %s1809_s18 = sshll.u32 %s1616_s30, 3  ;;  %s1810_s29 = sshll.u32 %s1405_s24, 7 }
 0x321   : > { %s345_s16 = scalar_lea.vmem [#allocation9], %s1809_s18  ;;  %s1730_s17 = scalar_lea.hbm %s1785_s6, %s1810_s29 }
 0x322   : > { %s833_s11 = sshll.u32 %s345_s16, 4  ;;  %s805_s27 = scalar_lea.sflag [#allocation10], %s1616_s30  ;;  %s1732_s11 = int_to_ptr.vmem [resolvable:$true] %s833_s11 }
 0x323   : > { %s1323_s28 = scalar_lea.vmem %s1732_s11, 128  ;;  %s1422_s10 = smov [#allocation9]  }
 0x324   : > { %p1324_p11 = scmp.ne.s32.totalorder %s1732_s11, %s1323_s28  ;;  %s1327_s19 = sshll.u32 %s1422_s10, 4  ;;  %s1328_s19 = int_to_ptr.vmem [resolvable:$false] %s1327_s19 }
 0x325   : > { %s1329_s24 = scalar_lea.vmem %s1328_s19, 256  ;;  %p1330_p9 = scmp.lt.s32.totalorder %s1732_s11, %s1328_s19 }
 0x326   : > { %p1325_p0 = pnand %p1324_p11, %p1557_p10  ;;  %p1331_p1 = scmp.lt.s32.totalorder %s1329_s24, %s1323_s28 }
 0x328   : > { %p1326_p5 = pneg %p1325_p0  ;;  %p1332_p2 = por %p1331_p1, %p1330_p9 }
 0x32a   : > { %p1333_p3 = pnand %p1332_p2, %p1326_p5 }
 0x39f   : > { %v794_v38 = vpop.xlane.xlu0 %793 }
 0x3a0   : > { %1235 = vrcp.f32 %v794_v38 }
 0x3aa   : > { %v1236_v40 = vpop.eup %1235 }
 0x3ab   : > { %v797_v41 = vmul.f32 %v1236_v40, %v795_v39 }
 0x3ad   : > { %798 = vst [vmem:[%s345_s16] sm:$0xff] %v797_v41 }
 0x3ae   : > { %1336 = shalt.err (!%p1333_p3)
}
 0x3af   : > { %s1337_s30 = scalar_lea.hbm %s1730_s17, 128  ;;  %s1341_s18 = scalar_lea.hbm %s1785_s6, 256 }
 0x3b0   : > { %p1338_p7 = scmp.ne.s32.totalorder %s1730_s17, %s1337_s30  ;;  %p1342_p6 = scmp.lt.u32.totalorder %s1730_s17, %s1785_s6 }
 0x3b1   : > { %p1343_p8 = scmp.lt.u32.totalorder %s1341_s18, %s1337_s30  ;;  %p1345_p11 = scmp.lt.u32.totalorder %s1337_s30, %s1730_s17 }
 0x3b2   : > { %p1339_p13 = pnand %p1338_p7, %p1557_p10 }
 0x3b3   : > { %p1344_p12 = por %p1343_p8, %p1342_p6 }
 0x3b4   : > { %p1340_p4 = pneg %p1339_p13 }
 0x3b5   : > { %p1346_p0 = por %p1345_p11, %p1344_p12 }
 0x3b7   : > { %p1347_p5 = pnand %p1346_p0, %p1340_p4 }
 0x3b9   : > { %1350 = shalt.err (!%p1347_p5)
}
 0x3ba   : > { %1142 = dma.vmem_to_hbm [thread:$0]  (%p1557_p10), %s1732_s11, 128, %s1730_s17, %s805_s27  }
 0x3bb PF: > { %s845_s15 = sand.u32 1, %s1393_s21   ;;  %p1811_p9 = scmp.ne.s32.totalorder %s1797_s8, 0 }
 0x3bc   : > { %p1812_p1 = scmp.ge.s32.totalorder %s1413_s26, 2  ;;  %s846_s14 = scalar_lea.sflag [#allocation5], %s845_s15 }
 0x3be   : > { %p1154_p2 = pnand %p1812_p1, %p1811_p9 }
 0x3c0   : > { %1384 = dma.done.wait (!%p1154_p2), %s846_s14, 128  }
 0x3c1   : > { %1386 = vsyncadd (!%p1154_p2), %s846_s14, 4294967168  ;;  %s855_s28 = scalar_lea.sflag [#allocation10], %s845_s15 }
 0x3c2   : > { %1388 = dma.done.wait (!%p1154_p2), %s855_s28, 128  }
 0x3c3   : > { %1390 = vsyncadd (!%p1154_p2), %s855_s28, 4294967168  ;;  %s27_s26 = sadd.s32 1, %s1413_s26   ;;  %s1813_s21 = smov %s1397_s22 }
 0x3c4   : > { %p24_p3 = scmp.ge.s32.totalorder %s27_s26, 4   ;;  %s1814_s22 = smov %s1401_s23 }
 0x3c5   : > { %s1815_s23 = smov %s1566_s20  ;;  %s1816_s24 = smov %s1409_s25 }
 0x3c6   : > { %s1817_s25 = smov %s1819_s13  ;;  %26 = sbr.rel (!%p24_p3) target bundleno = 9 (0x9), region = 116 }
 0x3cd   :  { %860 = vsyncpa [#allocation4], 1 }
 0x3ce   :  { %862 = vsyncpa [#allocation4 + $0x1], 1 }
 0x3cf   :  { %863 = vsyncpa [#allocation7], 1 }
 0x3d0   :  { %864 = vsyncpa [#allocation5], 1 }
 0x3d1   :  { %866 = vsyncpa [#allocation5 + $0x1], 1 }
 0x3d2   :  { %867 = vsyncpa [#allocation10], 1 }
 0x3d3   :  { %869 = vsyncpa [#allocation10 + $0x1], 1 }

</bundles_post_ra>
